<compile_context>
chip_gen: v5e
topology: v5e:2x2
jax: 0.10.0
libtpu: 0.0.40
codegen_flags: <defaults>
</compile_context>

<pallas_src>
import jax
import jax.numpy as jnp
from jax.experimental import pallas as pl
from jax.experimental.pallas import tpu as pltpu


def _cross_stitch_kernel(scal_ref, x1_ref, w1_ref, x2_ref, w2_ref, out_ref):
    """Streaming per-task dot product + cross-stitch mix.

    scal_ref (SMEM, (6,) f32): [bias_eff1, bias_eff2, u1.w1, u1.w2, u2.w1, u2.w2]
    x*_ref  : (Bt, D) raw images, flattened (c, h, w);  D = C_in*H*W
    w*_ref  : (1, D)  folded conv+head image weight (resident across grid steps)
    out_ref : (Bt, 2) -- column 0 = pred[0], column 1 = pred[1]
    """
    # VPU multiply (sublane-broadcast of the (1, D) weight) + one XLU lane reduce per task.
    p0 = jnp.sum(x1_ref[...] * w1_ref[...], axis=1, keepdims=True) + scal_ref[0]   # (Bt, 1)
    p1 = jnp.sum(x2_ref[...] * w2_ref[...], axis=1, keepdims=True) + scal_ref[1]   # (Bt, 1)

    # Cross-stitch units: a 2x2 scalar mix of the two task predictions.
    out_ref[:, 0:1] = (scal_ref[2] * p0 + scal_ref[3] * p1).astype(out_ref.dtype)
    out_ref[:, 1:2] = (scal_ref[4] * p0 + scal_ref[5] * p1).astype(out_ref.dtype)


def _fold_branch(conv_w, conv_b, head_w, head_b, h, w, stride):
    """Fold Conv2d(C_in->C_out, K, stride) -> flatten -> Linear(F -> 1) into a single
    (1, C_in*H*W) image-weight vector and a (1,) effective bias (inference only)."""
    c_out, c_in, k, _ = conv_w.shape
    latn = (h - k) // stride + 1
    lonn = (w - k) // stride + 1
    conv_w = conv_w.astype(jnp.float32)
    conv_b = conv_b.astype(jnp.float32)
    head_b = head_b.astype(jnp.float32)
    # PyTorch flattens the conv output channel-major: head_w[0, o*latn*lonn + oh*lonn + ow].
    head_3d = head_w.reshape(c_out, latn, lonn).astype(jnp.float32)

    w_img = jnp.zeros((c_in, h, w), jnp.float32)
    for kh in range(k):
        for kw in range(k):
            # Contribution of kernel tap (kh, kw) to the strided set of input pixels it touches.
            contrib = jnp.einsum("oc,ohw->chw", conv_w[:, :, kh, kw], head_3d)
            w_img = w_img.at[:, kh:kh + stride * latn:stride,
                                kw:kw + stride * lonn:stride].add(contrib)
    bias_eff = jnp.sum(conv_b[:, None, None] * head_3d) + head_b                   # (1,)
    return w_img.reshape(1, c_in * h * w), bias_eff.reshape(1)


def _pick_batch_tile(b, requested):
    if requested is not None:
        assert requested == b or (b % requested == 0 and requested % 8 == 0), (
            "batch_tile must equal B, or divide B and be a multiple of 8")
        return requested
    if b % 16 != 0:
        return b             # small / ragged batch: single tile
    tile = min(b // 2, 512)  # >= 2 grid steps (v7x megacore) and a VMEM-safe tile size
    while b % tile != 0:
        tile -= 8
    return tile


def cross_stitch_net_forward(x1, x2,
                             conv_w1, conv_b1, conv_w2, conv_b2,
                             head_w1, head_b1, head_w2, head_b2,
                             cs1_w1, cs1_w2, cs2_w1, cs2_w2,
                             *, stride, batch_tile=None):
    """Inference forward of CrossStitchNet. Returns [pred0, pred1], each (B, 1)."""
    # TODO(synk): nn.Dropout is identity at inference; train-mode masking not implemented.
    x1 = x1.astype(jnp.float32)          # matches inputs[i].float() in the PyTorch module
    x2 = x2.astype(jnp.float32)
    b, c_in, h, w = x1.shape
    d = c_in * h * w

    # One-time parameter fold (tiny, done in XLA): conv + width-1 head -> per-image weight.
    w_img1, b_eff1 = _fold_branch(conv_w1, conv_b1, head_w1, head_b1, h, w, stride)
    w_img2, b_eff2 = _fold_branch(conv_w2, conv_b2, head_w2, head_b2, h, w, stride)

    # Per-task scalars -> SMEM (scalar path; no (1, 1) VMEM tiles / wasted vld slots).
    scalars = jnp.concatenate(
        [b_eff1, b_eff2, cs1_w1, cs1_w2, cs2_w1, cs2_w2]).astype(jnp.float32)

    # Lane-dense (B, D) slabs; contiguous reshape (no HBM expansion, vs. im2col's 2.25x).
    x1_flat = x1.reshape(b, d)
    x2_flat = x2.reshape(b, d)

    batch_tile = _pick_batch_tile(b, batch_tile)
    grid = (b // batch_tile,)

    x_spec = pl.BlockSpec((batch_tile, d), lambda i: (i, 0))
    w_spec = pl.BlockSpec((1, d), lambda i: (0, 0))   # block index constant -> stays resident

    out = pl.pallas_call(
        _cross_stitch_kernel,
        out_shape=jax.ShapeDtypeStruct((b, 2), jnp.float32),
        grid_spec=pltpu.PrefetchScalarGridSpec(
            num_scalar_prefetch=0,
            grid=grid,
            in_specs=[pl.BlockSpec(memory_space=pltpu.MemorySpace.SMEM),
                      x_spec, w_spec, x_spec, w_spec],
            out_specs=pl.BlockSpec((batch_tile, 2), lambda i: (i, 0)),
        ),
        compiler_params=pltpu.CompilerParams(
            dimension_semantics=("parallel",)),
    )(scalars, x1_flat, w_img1, x2_flat, w_img2)

    # (B, 2) kernel output -> the module's list of (B, 1) predictions.
    return [out[:, 0:1], out[:, 1:2]]


def _reference_forward(x1, x2, conv_w1, conv_b1, conv_w2, conv_b2,
                       head_w1, head_b1, head_w2, head_b2,
                       cs1_w1, cs1_w2, cs2_w1, cs2_w2, *, stride):
    def task(x, cw, cb, hw, hb):
        y = jax.lax.conv_general_dilated(
            x.astype(jnp.float32), cw, window_strides=(stride, stride),
            padding="VALID", dimension_numbers=("NCHW", "OIHW", "NCHW"))
        y = y + cb[None, :, None, None]
        y = y.reshape(y.shape[0], -1)
        return y @ hw.T + hb                      # (B, 1)

    p0 = task(x1, conv_w1, conv_b1, head_w1, head_b1)
    p1 = task(x2, conv_w2, conv_b2, head_w2, head_b2)
    out0 = cs1_w1 * p0 + cs1_w2 * p1
    out1 = cs2_w2 * p1 + cs2_w1 * p0
    return [out0, out1]


if __name__ == "__main__":
    cfg = {
        "spatial_offset": 7,     # input spatial extent = 2*7 + 1 = 15
        "kernel_size": 3,
        "stride_cnn": 2,
        "input_size_cnn": 4,
        "hidden_size": 8,
        "dropout_rate": 0.1,     # inference: dropout is identity
        "num_repeat": 2,
    }
    B = 2
    H = W = 2 * cfg["spatial_offset"] + 1
    K = cfg["kernel_size"]
    S = cfg["stride_cnn"]
    C_in = cfg["input_size_cnn"]
    C_out = cfg["hidden_size"]
    latn = lonn = (H - K) // S + 1
    F = C_out * latn * lonn

    key = jax.random.PRNGKey(0)
    ks = jax.random.split(key, 12)

    x1 = jax.random.normal(ks[0], (B, C_in, H, W), dtype=jnp.float32)
    x2 = jax.random.normal(ks[1], (B, C_in, H, W), dtype=jnp.float32)

    # Synthetic deterministic parameters with torch-like init bounds.
    cb_bound = 1.0 / (C_in * K * K) ** 0.5
    conv_w1 = jax.random.uniform(ks[2], (C_out, C_in, K, K), jnp.float32, -cb_bound, cb_bound)
    conv_b1 = jax.random.uniform(ks[3], (C_out,), jnp.float32, -cb_bound, cb_bound)
    conv_w2 = jax.random.uniform(ks[4], (C_out, C_in, K, K), jnp.float32, -cb_bound, cb_bound)
    conv_b2 = jax.random.uniform(ks[5], (C_out,), jnp.float32, -cb_bound, cb_bound)

    hb_bound = 1.0 / F ** 0.5
    head_w1 = jax.random.uniform(ks[6], (1, F), jnp.float32, -hb_bound, hb_bound)
    head_b1 = jax.random.uniform(ks[7], (1,), jnp.float32, -hb_bound, hb_bound)
    head_w2 = jax.random.uniform(ks[8], (1, F), jnp.float32, -hb_bound, hb_bound)
    head_b2 = jax.random.uniform(ks[9], (1,), jnp.float32, -hb_bound, hb_bound)

    # CrossStitchUnit: weight1 ~ U(0,1), weight2 = 1 - weight1 (as at init).
    cs1_w1 = jax.random.uniform(ks[10], (1,), jnp.float32)
    cs1_w2 = 1.0 - cs1_w1
    cs2_w1 = jax.random.uniform(ks[11], (1,), jnp.float32)
    cs2_w2 = 1.0 - cs2_w1

    preds = cross_stitch_net_forward(
        x1, x2, conv_w1, conv_b1, conv_w2, conv_b2,
        head_w1, head_b1, head_w2, head_b2,
        cs1_w1, cs1_w2, cs2_w1, cs2_w2, stride=S)
    preds = jax.block_until_ready(preds)

    ref = _reference_forward(
        x1, x2, conv_w1, conv_b1, conv_w2, conv_b2,
        head_w1, head_b1, head_w2, head_b2,
        cs1_w1, cs1_w2, cs2_w1, cs2_w2, stride=S)

    assert preds[0].shape == (B, 1) and preds[1].shape == (B, 1)
    assert jnp.allclose(preds[0], ref[0], atol=1e-4, rtol=1e-4)
    assert jnp.allclose(preds[1], ref[1], atol=1e-4, rtol=1e-4)

    print("KERNEL_OK")
</pallas_src>

<mosaic_0001>
module attributes {stable_mosaic.version = 11 : i64} {
  func.func @_cross_stitch_kernel(%arg0: i32, %arg1: memref<6xf32, #tpu.memory_space<smem>>, %arg2: memref<2x900xf32, #tpu.memory_space<vmem>>, %arg3: memref<1x900xf32, #tpu.memory_space<vmem>>, %arg4: memref<2x900xf32, #tpu.memory_space<vmem>>, %arg5: memref<1x900xf32, #tpu.memory_space<vmem>>, %arg6: memref<2x2xf32, #tpu.memory_space<vmem>>) attributes {dimension_semantics = [#tpu.dimension_semantics<parallel>], iteration_bounds = array<i64: 1>, scalar_prefetch = 0 : i64, scratch_operands = 0 : i64, tpu.core_type = #tpu.core_type<tc>, window_params = [{transform_indices = @transform_0, window_bounds = array<i64: 6>}, {transform_indices = @transform_1, window_bounds = array<i64: 2, 900>}, {pipeline_mode = #tpu.pipeline_mode<synchronous>, transform_indices = @transform_2, window_bounds = array<i64: 1, 900>}, {transform_indices = @transform_3, window_bounds = array<i64: 2, 900>}, {pipeline_mode = #tpu.pipeline_mode<synchronous>, transform_indices = @transform_4, window_bounds = array<i64: 1, 900>}, {transform_indices = @transform_5, window_bounds = array<i64: 2, 2>}]} {
    %c0 = arith.constant 0 : index
    %c0_0 = arith.constant 0 : index
    %0 = vector.load %arg2[%c0, %c0_0] : memref<2x900xf32, #tpu.memory_space<vmem>>, vector<2x900xf32>
    %c0_1 = arith.constant 0 : index
    %c0_2 = arith.constant 0 : index
    %1 = vector.load %arg3[%c0_1, %c0_2] : memref<1x900xf32, #tpu.memory_space<vmem>>, vector<1x900xf32>
    %2 = vector.broadcast %1 : vector<1x900xf32> to vector<2x900xf32>
    %3 = arith.mulf %0, %2 : vector<2x900xf32>
    %cst = arith.constant dense<0.000000e+00> : vector<2xf32>
    %4 = vector.multi_reduction <add>, %3, %cst [1] : vector<2x900xf32> to vector<2xf32>
    %5 = vector.shape_cast %4 : vector<2xf32> to vector<2x1xf32>
    %c0_3 = arith.constant 0 : index
    %6 = memref.load %arg1[%c0_3] : memref<6xf32, #tpu.memory_space<smem>>
    %7 = vector.broadcast %6 : f32 to vector<2x1xf32>
    %8 = arith.addf %5, %7 : vector<2x1xf32>
    %c0_4 = arith.constant 0 : index
    %c0_5 = arith.constant 0 : index
    %9 = vector.load %arg4[%c0_4, %c0_5] : memref<2x900xf32, #tpu.memory_space<vmem>>, vector<2x900xf32>
    %c0_6 = arith.constant 0 : index
    %c0_7 = arith.constant 0 : index
    %10 = vector.load %arg5[%c0_6, %c0_7] : memref<1x900xf32, #tpu.memory_space<vmem>>, vector<1x900xf32>
    %11 = vector.broadcast %10 : vector<1x900xf32> to vector<2x900xf32>
    %12 = arith.mulf %9, %11 : vector<2x900xf32>
    %cst_8 = arith.constant dense<0.000000e+00> : vector<2xf32>
    %13 = vector.multi_reduction <add>, %12, %cst_8 [1] : vector<2x900xf32> to vector<2xf32>
    %14 = vector.shape_cast %13 : vector<2xf32> to vector<2x1xf32>
    %c1 = arith.constant 1 : index
    %15 = memref.load %arg1[%c1] : memref<6xf32, #tpu.memory_space<smem>>
    %16 = vector.broadcast %15 : f32 to vector<2x1xf32>
    %17 = arith.addf %14, %16 : vector<2x1xf32>
    %c2 = arith.constant 2 : index
    %18 = memref.load %arg1[%c2] : memref<6xf32, #tpu.memory_space<smem>>
    %19 = vector.broadcast %18 : f32 to vector<2x1xf32>
    %20 = arith.mulf %19, %8 : vector<2x1xf32>
    %c3 = arith.constant 3 : index
    %21 = memref.load %arg1[%c3] : memref<6xf32, #tpu.memory_space<smem>>
    %22 = vector.broadcast %21 : f32 to vector<2x1xf32>
    %23 = arith.mulf %22, %17 : vector<2x1xf32>
    %24 = arith.addf %20, %23 : vector<2x1xf32>
    %c0_9 = arith.constant 0 : index
    %c0_10 = arith.constant 0 : index
    %25 = vector.load %arg6[%c0_9, %c0_10] : memref<2x2xf32, #tpu.memory_space<vmem>>, vector<2x1xf32>
    tpu.vector_store %arg6[%c0_9, %c0_10], %24 {strides = array<i32>} : memref<2x2xf32, #tpu.memory_space<vmem>>, vector<2x1xf32>,
    %c4 = arith.constant 4 : index
    %26 = memref.load %arg1[%c4] : memref<6xf32, #tpu.memory_space<smem>>
    %27 = vector.broadcast %26 : f32 to vector<2x1xf32>
    %28 = arith.mulf %27, %8 : vector<2x1xf32>
    %c5 = arith.constant 5 : index
    %29 = memref.load %arg1[%c5] : memref<6xf32, #tpu.memory_space<smem>>
    %30 = vector.broadcast %29 : f32 to vector<2x1xf32>
    %31 = arith.mulf %30, %17 : vector<2x1xf32>
    %32 = arith.addf %28, %31 : vector<2x1xf32>
    %c0_11 = arith.constant 0 : index
    %c1_12 = arith.constant 1 : index
    %33 = vector.load %arg6[%c0_11, %c1_12] : memref<2x2xf32, #tpu.memory_space<vmem>>, vector<2x1xf32>
    tpu.vector_store %arg6[%c0_11, %c1_12], %32 {strides = array<i32>} : memref<2x2xf32, #tpu.memory_space<vmem>>, vector<2x1xf32>,
    return
  }
  func.func @transform_0(%arg0: i32) -> i32 {
    %c0_i32 = arith.constant 0 : i32
    %c0_i32_0 = arith.constant 0 : i32
    return %c0_i32 : i32
  }
  func.func @transform_1(%arg0: i32) -> (i32, i32) {
    %c0_i32 = arith.constant 0 : i32
    %c0_i32_0 = arith.constant 0 : i32
    return %arg0, %c0_i32 : i32, i32
  }
  func.func @transform_2(%arg0: i32) -> (i32, i32) {
    %c0_i32 = arith.constant 0 : i32
    %c0_i32_0 = arith.constant 0 : i32
    %c0_i32_1 = arith.constant 0 : i32
    return %c0_i32, %c0_i32_0 : i32, i32
  }
  func.func @transform_3(%arg0: i32) -> (i32, i32) {
    %c0_i32 = arith.constant 0 : i32
    %c0_i32_0 = arith.constant 0 : i32
    return %arg0, %c0_i32 : i32, i32
  }
  func.func @transform_4(%arg0: i32) -> (i32, i32) {
    %c0_i32 = arith.constant 0 : i32
    %c0_i32_0 = arith.constant 0 : i32
    %c0_i32_1 = arith.constant 0 : i32
    return %c0_i32, %c0_i32_0 : i32, i32
  }
  func.func @transform_5(%arg0: i32) -> (i32, i32) {
    %c0_i32 = arith.constant 0 : i32
    %c0_i32_0 = arith.constant 0 : i32
    return %arg0, %c0_i32 : i32, i32
  }
}

</mosaic_0001>

<bundles_post_ra>
// kernel: tpu_custom_call.1
= control target key start
LH: loop header
LB: loop body
LE: loop exit
PB: predicated region body
PF: predicated region fallthrough
CT: control target
= control target key end

     0   :  { %10 = vsyncpa [#allocation5], 0  ;;  %s504_s0 = inlined_call_operand.hbm [shape: f32[6], index: 0, kind: input, shape index: {}]   ;;  %s505_s1 = inlined_call_operand.hbm [shape: f32[2,900], index: 1, kind: input, shape index: {}]   ;;  %s506_s2 = inlined_call_operand.hbm [shape: f32[1,900], index: 2, kind: input, shape index: {}]   ;;  %s507_s3 = inlined_call_operand.hbm [shape: f32[2,900], index: 3, kind: input, shape index: {}]   ;;  %s508_s4 = inlined_call_operand.hbm [shape: f32[1,900], index: 4, kind: input, shape index: {}]   ;;  %s509_s5 = inlined_call_operand.hbm [shape: f32[2,2], index: 5, kind: output, shape index: {}]  }
   0x1   :  { %11 = vsyncpa [#allocation3], 0 }
   0x2   :  { %12 = vsyncpa [#allocation8], 0 }
   0x3   :  { %13 = vsyncpa [#allocation11], 0  ;;  %s40_s20 = sshll.u32 %s506_s2, 4  ;;  %s41_s20 = int_to_ptr.hbm [resolvable:$true] %s40_s20 }
   0x4   :  { %14 = vsyncpa [#allocation4], 0  ;;  %s422_s21 = smov [#allocation7]   ;;  %s20_s25 = sshll.u32 %s504_s0, 4  ;;  %s21_s25 = int_to_ptr.hbm [resolvable:$true] %s20_s25 }
   0x5   :  { %s42_s22 = sshll.u32 %s422_s21, 4  ;;  %s423_s26 = smov [#allocation2]   ;;  %s43_s22 = int_to_ptr.vmem [resolvable:$true] %s42_s22 }
   0x6   :  { %45 = dma.hbm_to_vmem [thread:$0]  %s41_s20, 128, %s43_s22, [#allocation8]  }
   0x7   :  { %23 = dma.hbm_to_smem %s21_s25, 16, %s423_s26, [#allocation5]  }
   0x8   :  { %s29_s29 = sshll.u32 %s505_s1, 4  ;;  %s424_s30 = smov [#allocation6]   ;;  %s30_s29 = int_to_ptr.hbm [resolvable:$true] %s29_s29 }
   0x9   :  { %s31_s2 = sshll.u32 %s424_s30, 4  ;;  %s51_s8 = sshll.u32 %s507_s3, 4  ;;  %s32_s2 = int_to_ptr.vmem [resolvable:$true] %s31_s2  ;;  %s52_s8 = int_to_ptr.hbm [resolvable:$true] %s51_s8 }
   0xa   :  { %34 = dma.hbm_to_vmem [thread:$0]  %s30_s29, 256, %s32_s2, [#allocation3]  }
   0xb   :  { %s425_s9 = smov [#allocation9]   ;;  %s62_s12 = sshll.u32 %s508_s4, 4  ;;  %s63_s12 = int_to_ptr.hbm [resolvable:$true] %s62_s12 }
   0xc   :  { %s53_s0 = sshll.u32 %s425_s9, 4  ;;  %s426_s1 = smov [#allocation10]   ;;  %s54_s0 = int_to_ptr.vmem [resolvable:$true] %s53_s0 }
   0xd   :  { %56 = dma.hbm_to_vmem [thread:$0]  %s52_s8, 256, %s54_s0, [#allocation8]  }
   0xe   :  { %s64_s13 = sshll.u32 %s426_s1, 4  ;;  %s65_s13 = int_to_ptr.vmem [resolvable:$true] %s64_s13 }
   0xf   :  { %67 = dma.hbm_to_vmem [thread:$0]  %s63_s12, 128, %s65_s13, [#allocation11]  }
  0x10   :  { %412 = dma.done.wait [#allocation5], 16  }
  0x11   :  { %413 = vsyncadd [#allocation5], 4294967280 }
  0x12   :  { %414 = dma.done.wait [#allocation3], 256  }
  0x13   :  { %415 = vsyncadd [#allocation3], 4294967040 }
  0x14   :  { %416 = dma.done.wait [#allocation8], 384  }
  0x15   :  { %417 = vsyncadd [#allocation8], 4294966912 }
  0x16   :  { %418 = dma.done.wait [#allocation11], 128  }
  0x17   :  { %419 = vsyncadd [#allocation11], 4294967168 }
  0x18   :  { %88 = sfence }
  0x19   :  { %v91_v0 = vld [vmem:[#allocation7] sm:$0xff]  ;;  %vm107_vm0 = vcmask 1041408   ;;  %vm109_vm1 = vcmask 1045508   ;;  %v164_v9 = vld [vmem:[#allocation10] sm:$0xff]  ;;  %vm111_vm2 = vcmask 1043456   ;;  %v89_v13 = vld [vmem:[#allocation6] sm:$0xff] }
  0x1a   :  { %v93_v1 = vperm.slane %v91_v0, 0  ;;  %v94_v2 = vperm.slane %v91_v0, 1  ;;  %v95_v3 = vperm.slane %v91_v0, 2  ;;  %v96_v4 = vperm.slane %v91_v0, 3  ;;  %v90_v18 = vld [vmem:[#allocation6 + $0x8] sm:$0xff]  ;;  %v162_v44 = vld [vmem:[#allocation9] sm:$0xff] }
  0x1b   :  { %v97_v5 = vperm.slane %v91_v0, 4  ;;  %v98_v6 = vperm.slane %v91_v0, 5  ;;  %v99_v7 = vperm.slane %v91_v0, 6  ;;  %v100_v8 = vperm.slane %v91_v0, 7  ;;  %v163_v46 = vld [vmem:[#allocation9 + $0x8] sm:$0xff]  ;;  %s159_s3 = sld [smem:[#allocation2]] }
  0x1c   :  { %v101_v10 = vrot.slane %v94_v2, 6  ;;  %v102_v11 = vrot.slane %v95_v3, 4  ;;  %v103_v12 = vrot.slane %v96_v4, 2  ;;  %v166_v17 = vperm.slane %v164_v9, 0  ;;  %s270_s4 = sld [smem:[#allocation2 + $0x2]]  ;;  %s427_s18 = smov [#allocation12]  }
  0x1d   :  { %v104_v14 = vrot.slane %v98_v6, 6  ;;  %v105_v15 = vrot.slane %v99_v7, 4  ;;  %v106_v16 = vrot.slane %v100_v8, 2  ;;  %v167_v21 = vperm.slane %v164_v9, 1  ;;  %s272_s14 = sld [smem:[#allocation2 + $0x4]]  ;;  %s254_s19 = sshll.u32 %s427_s18, 4  ;;  %s255_s19 = int_to_ptr.vmem [resolvable:$true] %s254_s19 }
  0x1e   :  { %v108_v19 = vsel %vm107_vm0, %v93_v1, %v101_v10  ;;  %v110_v20 = vsel %vm109_vm1, %v102_v11, %v103_v12  ;;  %v168_v22 = vperm.slane %v164_v9, 2  ;;  %v169_v26 = vperm.slane %v164_v9, 3  ;;  %s269_s15 = sld [smem:[#allocation2 + $0x1]]  ;;  %s256_s22 = sshll.u32 %s509_s5, 4  ;;  %s257_s22 = int_to_ptr.hbm [resolvable:$true] %s256_s22 }
  0x1f   :  { %v112_v23 = vsel %vm111_vm2, %v108_v19, %v110_v20  ;;  %v113_v24 = vsel %vm107_vm0, %v97_v5, %v104_v14  ;;  %v114_v25 = vsel %vm109_vm1, %v105_v15, %v106_v16  ;;  %v170_v29 = vperm.slane %v164_v9, 4  ;;  %s271_s16 = sld [smem:[#allocation2 + $0x3]] }
  0x20   :  { %v115_v27 = vsel %vm111_vm2, %v113_v24, %v114_v25  ;;  %v118_v28 = vmul.f32 %v112_v23, %v89_v13  ;;  %v171_v30 = vperm.slane %v164_v9, 5  ;;  %v172_v32 = vperm.slane %v164_v9, 6  ;;  %s273_s17 = sld [smem:[#allocation2 + $0x5]] }
  0x21   :  { %v119_v31 = vmul.f32 %v115_v27, %v90_v18  ;;  %v173_v33 = vperm.slane %v164_v9, 7  ;;  %v174_v34 = vrot.slane %v167_v21, 6  ;;  %v175_v35 = vrot.slane %v168_v22, 4 }
  0x22   :  { %122 = vst [vmem:[#allocation1] ss:$4 sm:$0xff] %v118_v28  ;;  %v176_v36 = vrot.slane %v169_v26, 2  ;;  %v177_v37 = vrot.slane %v171_v30, 6  ;;  %v178_v38 = vrot.slane %v172_v32, 4  ;;  %vm154_vm3 = vcmask 25600  }
  0x23   :  { %124 = vst [vmem:[#allocation1 + $0x20] ss:$4 sm:$0xff] %v119_v31  ;;  %v179_v39 = vrot.slane %v173_v33, 2  ;;  %v180_v40 = vsel %vm107_vm0, %v166_v17, %v174_v34  ;;  %v160_v33 = vstv %s159_s3  ;;  %vm238_vm4 = vcmask 1024  }
  0x24   :  { %v181_v41 = vsel %vm109_vm1, %v175_v35, %v176_v36  ;;  %v183_v42 = vsel %vm107_vm0, %v170_v29, %v177_v37  ;;  %v229_v34 = vstv %s269_s15  ;;  %v232_v36 = vstv %s270_s4 }
  0x25   :  { %v184_v43 = vsel %vm109_vm1, %v178_v38, %v179_v39  ;;  %v182_v45 = vsel %vm111_vm2, %v180_v40, %v181_v41  ;;  %v241_v37 = vstv %s272_s14  ;;  %v235_v38 = vstv %s271_s16 }
  0x26   :  { %v185_v47 = vsel %vm111_vm2, %v183_v42, %v184_v43  ;;  %v188_v50 = vmul.f32 %v182_v45, %v162_v44  ;;  %v244_v39 = vstv %s273_s17  ;;  %vm247_vm5 = vcmask 9224  }
  0x27   :  { %v189_v53 = vmul.f32 %v185_v47, %v163_v46 }
  0x29   :  { %v125_v48 = vld.sshfl [vmem:[#allocation1] sm:$0xff pattern:$0x73625140]  ;;  %v126_v49 = vld.sshfl [vmem:[#allocation1 + $0x8] sm:$0xff pattern:$0x73625140] }
  0x2a   :  { %v127_v51 = vld.sshfl [vmem:[#allocation1 + $0x10] sm:$0xff pattern:$0x73625140]  ;;  %v128_v52 = vld.sshfl [vmem:[#allocation1 + $0x18] sm:$0xff pattern:$0x73625140] }
  0x2b   :  { %v129_v54 = vld.sshfl [vmem:[#allocation1 + $0x20] sm:$0xff pattern:$0x73625140]  ;;  %v130_v55 = vld.sshfl [vmem:[#allocation1 + $0x28] sm:$0xff pattern:$0x73625140] }
  0x2c   :  { %v131_v56 = vld.sshfl [vmem:[#allocation1 + $0x30] sm:$0xff pattern:$0x73625140]  ;;  %v132_v57 = vld.sshfl [vmem:[#allocation1 + $0x38] sm:$0xff pattern:$0x73625140] }
  0x2d   :  { %v141_v58 = vsel %vm107_vm0, %v125_v48, 0.0  ;;  %v142_v59 = vsel %vm107_vm0, %v126_v49, 0.0  ;;  %v144_v60 = vsel %vm107_vm0, %v127_v51, 0.0  ;;  %192 = vst [vmem:[#allocation1] ss:$4 sm:$0xff] %v188_v50  ;;  %v146_v62 = vsel %vm107_vm0, %v128_v52, 0.0 }
  0x2e   :  { %v143_v61 = vadd.f32 %v142_v59, %v141_v58  ;;  %194 = vst [vmem:[#allocation1 + $0x20] ss:$4 sm:$0xff] %v189_v53  ;;  %v148_v0 = vsel %vm107_vm0, %v129_v54, 0.0  ;;  %v150_v2 = vsel %vm107_vm0, %v130_v55, 0.0  ;;  %v152_v4 = vsel %vm107_vm0, %v131_v56, 0.0 }
  0x2f   :  { %v155_v9 = vsel %vm154_vm3, %v132_v57, 0.0 }
  0x30   :  { %v145_v63 = vadd.f32 %v144_v60, %v143_v61 }
  0x32   :  { %v147_v1 = vadd.f32 %v146_v62, %v145_v63 }
  0x34   :  { %v149_v3 = vadd.f32 %v148_v0, %v147_v1  ;;  %v195_v5 = vld.sshfl [vmem:[#allocation1] sm:$0xff pattern:$0x73625140]  ;;  %v196_v6 = vld.sshfl [vmem:[#allocation1 + $0x8] sm:$0xff pattern:$0x73625140] }
  0x35   :  { %v197_v7 = vld.sshfl [vmem:[#allocation1 + $0x10] sm:$0xff pattern:$0x73625140]  ;;  %v198_v10 = vld.sshfl [vmem:[#allocation1 + $0x18] sm:$0xff pattern:$0x73625140] }
  0x36   :  { %v151_v8 = vadd.f32 %v150_v2, %v149_v3  ;;  %v211_v12 = vsel %vm107_vm0, %v195_v5, 0.0  ;;  %v212_v13 = vsel %vm107_vm0, %v196_v6, 0.0  ;;  %v214_v14 = vsel %vm107_vm0, %v197_v7, 0.0  ;;  %v199_v15 = vld.sshfl [vmem:[#allocation1 + $0x20] sm:$0xff pattern:$0x73625140] }
  0x37   :  { %v213_v16 = vadd.f32 %v212_v13, %v211_v12  ;;  %v216_v18 = vsel %vm107_vm0, %v198_v10, 0.0  ;;  %v200_v19 = vld.sshfl [vmem:[#allocation1 + $0x28] sm:$0xff pattern:$0x73625140]  ;;  %v218_v21 = vsel %vm107_vm0, %v199_v15, 0.0 }
  0x38   :  { %v153_v11 = vadd.f32 %v152_v4, %v151_v8  ;;  %v201_v22 = vld.sshfl [vmem:[#allocation1 + $0x30] sm:$0xff pattern:$0x73625140]  ;;  %v220_v24 = vsel %vm107_vm0, %v200_v19, 0.0 }
  0x39   :  { %v215_v20 = vadd.f32 %v214_v14, %v213_v16  ;;  %v202_v25 = vld.sshfl [vmem:[#allocation1 + $0x38] sm:$0xff pattern:$0x73625140]  ;;  %v222_v27 = vsel %vm107_vm0, %v201_v22, 0.0 }
  0x3a   :  { %v156_v17 = vadd.f32 %v155_v9, %v153_v11  ;;  %v224_v29 = vsel %vm154_vm3, %v202_v25, 0.0 }
  0x3b   :  { %v217_v23 = vadd.f32 %v216_v18, %v215_v20 }
  0x3c   :  { %157 = vadd.xlane.f32.xlu0 %v156_v17 }
  0x3d   :  { %v219_v26 = vadd.f32 %v218_v21, %v217_v23 }
  0x3f   :  { %v221_v28 = vadd.f32 %v220_v24, %v219_v26 }
  0x41   :  { %v223_v30 = vadd.f32 %v222_v27, %v221_v28 }
  0x43   :  { %v225_v31 = vadd.f32 %v224_v29, %v223_v30 }
  0x45   :  { %226 = vadd.xlane.f32.xlu0 %v225_v31 }
  0xaf   :  { %v158_v32 = vpop.xlane.xlu0 %157 }
  0xb0   :  { %v161_v35 = vadd.f32 %v160_v33, %v158_v32 }
  0xb2   :  { %v233_v42 = vmul.f32 %v232_v36, %v161_v35  ;;  %v242_v43 = vmul.f32 %v241_v37, %v161_v35 }
  0xb8   :  { %v227_v40 = vpop.xlane.xlu0 %226 }
  0xb9   :  { %v230_v41 = vadd.f32 %v229_v34, %v227_v40 }
  0xbb   :  { %v236_v44 = vmul.f32 %v235_v38, %v230_v41  ;;  %v245_v45 = vmul.f32 %v244_v39, %v230_v41 }
  0xbd   :  { %v237_v46 = vadd.f32 %v236_v44, %v233_v42  ;;  %v246_v47 = vadd.f32 %v245_v45, %v242_v43 }
  0xbf   :  { %239 = vst.msk [vmem:[#allocation12] sm:$0x3] %vm238_vm4, %v237_v46 }
  0xc0   :  { %248 = vst.msk [vmem:[#allocation12] sm:$0x3] %vm247_vm5, %v246_v47 }
  0xc1   :  { %259 = dma.vmem_to_hbm [thread:$0]  %s255_s19, 32, %s257_s22, [#allocation4]  }
  0xc2   :  { %420 = dma.done.wait [#allocation4], 32  }
  0xc3   :  { %421 = vsyncadd [#allocation4], 4294967264 }
  0xc4   :  { %264 = vsyncpa [#allocation3], 1 }
  0xc5   :  { %265 = vsyncpa [#allocation8], 1 }
  0xc6   :  { %266 = vsyncpa [#allocation11], 1 }
  0xc7   :  { %267 = vsyncpa [#allocation4], 1 }
  0xc8   :  { %268 = vsyncpa [#allocation5], 1 }

</bundles_post_ra>
